<compile_context>
chip_gen: v7x
topology: tpu7x:2x2x1
jax: 0.10.0
libtpu: 0.0.40
codegen_flags: <defaults>
</compile_context>

<pallas_src>
import jax
import jax.numpy as jnp
from jax.experimental import pallas as pl
from jax.experimental.pallas import tpu as pltpu


def _cdiv(a: int, b: int) -> int:
    return -(-a // b)


def _interp_matrix(out_size: int, in_size: int) -> jnp.ndarray:
    """1-D interpolation matrix (out_size, in_size) matching
    torch.nn.functional.interpolate(mode='bilinear', align_corners=False)."""
    scale = in_size / out_size
    dst = jnp.arange(out_size, dtype=jnp.float32)
    src = scale * (dst + 0.5) - 0.5
    src = jnp.maximum(src, 0.0)                       # PyTorch clamps negative to 0
    i0 = jnp.clip(jnp.floor(src).astype(jnp.int32), 0, in_size - 1)
    i1 = jnp.minimum(i0 + 1, in_size - 1)
    w1 = src - i0.astype(jnp.float32)
    w0 = 1.0 - w1
    eye = jnp.eye(in_size, dtype=jnp.float32)
    return w0[:, None] * eye[i0] + w1[:, None] * eye[i1]


def _hw_config():
    """Generation-dependent knobs: VMEM budget/limit, MXU tile, #TensorCores."""
    kind = ""
    try:
        kind = str(jax.devices()[0].device_kind).lower()
    except Exception:
        pass

    is_v5e = any(t in kind for t in ("v5e", "v5 lite", "v5lite"))
    is_v6e = any(t in kind for t in ("v6e", "v6 lite", "v6lite"))
    # Chips with >1 TensorCore per chip (megacore / v7x); unknown -> assume single TC
    # so we never pay for masked overflow slices by mistake.
    multi_tc = (not (is_v5e or is_v6e)) and any(
        t in kind for t in ("v2", "v3", "v4", "v5p", "v7"))

    vmem_phys = None
    try:
        vmem_phys = int(getattr(pltpu.get_tpu_info(), "vmem_capacity_bytes"))
    except Exception:
        vmem_phys = None
    if vmem_phys is None:
        if kind and ("v7" not in kind) and any(t in kind for t in ("v4", "v5", "v6")):
            vmem_phys = 128 * 1024 * 1024
        else:
            vmem_phys = 64 * 1024 * 1024              # conservative (v7x-sized)

    big_vmem = vmem_phys >= 100 * 1024 * 1024
    vmem_budget = min((72 if big_vmem else 20) * 1024 * 1024, int(vmem_phys * 0.55))
    vmem_limit = min((100 if big_vmem else 44) * 1024 * 1024, int(vmem_phys * 0.85))
    return {
        "mxu_dim": 128 if is_v5e else 256,
        "multi_tc": multi_tc,
        "vmem_budget": vmem_budget,
        "vmem_limit": vmem_limit,
    }


def _choose_tb(n, hp, wlp, hg, wlg, pred_bytes, gt_bytes, mm_bytes, needs_resize,
               vmem_budget):
    """Pick the channel-batch TB so double-buffered blocks + matmul temporaries fit
    VMEM.  Register-fused elementwise temporaries (pred cast, diff, sq) are NOT
    counted -- they never persist in VMEM."""
    per = 2 * (hp * wlp * pred_bytes + hg * wlg * gt_bytes)      # dbl-buffered DMA blocks
    if needs_resize:
        per += hp * hg * mm_bytes                    # broadcast wh (batched dot lhs)
        per += mm_bytes * max(hg * wlp, hp * wlg)    # interp intermediate t
        per += 4 * hp * wlp                          # gt_r (f32)
    const = 4 * hp * wlp                             # resident f32 accumulator scratch
    const += 2 * 4 * wlp                             # (1,1,wlp) output block
    if needs_resize:
        const += 2 * mm_bytes * (hp * hg + wlg * wlp)  # interp matrices (dbl-buffered)
    avail = max(vmem_budget - const, per)
    return int(max(1, min(avail // per, n, 512)))


def _make_kernel(*, needs_resize: bool, cols_first: bool, need_mask: bool,
                 n_valid: int, mm_is_f32: bool):
    def kernel(*refs):
        if needs_resize:
            pred_ref, gt_ref, wh_ref, wwt_ref, out_ref, acc_ref = refs
        else:
            pred_ref, gt_ref, out_ref, acc_ref = refs

        g = pl.program_id(1)

        # Zero this core's resident partial-sum accumulator at the start of its run.
        @pl.when(g == 0)
        def _():
            acc_ref[...] = jnp.zeros_like(acc_ref)

        tb, hp, wlp = pred_ref.shape
        _, hg, wlg = gt_ref.shape

        pred = pred_ref[...].astype(jnp.float32)              # (TB, Hp, Wlp)

        if needs_resize:
            wh = wh_ref[...]                                   # (Hp, Hg)   mm dtype
            wwt = wwt_ref[...]                                 # (Wlg, Wlp) mm dtype
            gt_op = gt_ref[...]
            if mm_is_f32:
                gt_op = gt_op.astype(jnp.float32)
            mmd = gt_op.dtype
            if cols_first:
                # Column interp: one big 2-D MXU matmul over the merged (TB*Hg) rows.
                t = jnp.dot(gt_op.reshape(tb * hg, wlg), wwt,
                            preferred_element_type=jnp.float32)
                t = t.reshape(tb, hg, wlp).astype(mmd)         # (TB, Hg, Wlp)
                # Row interp: batched matmul (Mosaic-safe); wh broadcast in mm dtype.
                wh_b = jnp.broadcast_to(wh, (tb, hp, hg))
                gt_r = jnp.einsum('bhg,bgw->bhw', wh_b, t,
                                  preferred_element_type=jnp.float32)
            else:
                wh_b = jnp.broadcast_to(wh, (tb, hp, hg))
                t = jnp.einsum('bhg,bgw->bhw', wh_b, gt_op,
                               preferred_element_type=jnp.float32)   # (TB, Hp, Wlg)
                t = t.astype(mmd)
                gt_r = jnp.dot(t.reshape(tb * hp, wlg), wwt,
                               preferred_element_type=jnp.float32)
                gt_r = gt_r.reshape(tb, hp, wlp)
        else:
            gt_r = gt_ref[...].astype(jnp.float32)

        diff = pred - gt_r
        sq = diff * diff                                        # (TB, Hp, Wlp) f32

        def _accumulate(vals):
            # Pure VPU: reduce over the leading vreg-stack axis, add into scratch.
            acc_ref[...] += jnp.sum(vals, axis=0, keepdims=True)

        if need_mask:
            # Only the last (partial / clamped-overflow) blocks need masking.
            n_lin = pl.program_id(0) * pl.num_programs(1) + g
            valid = n_valid - n_lin * tb

            @pl.when(valid >= tb)
            def _():
                _accumulate(sq)

            @pl.when(valid < tb)
            def _():
                row = jax.lax.broadcasted_iota(jnp.int32, sq.shape, 0)
                _accumulate(jnp.where(row < valid, sq, 0.0))
        else:
            _accumulate(sq)

        # Final per-part reduce: collapse sublanes once, write a tiny (1,1,Wlp) slab.
        @pl.when(g == pl.num_programs(1) - 1)
        def _():
            out_ref[...] = jnp.sum(acc_ref[...], axis=1, keepdims=True)

    return kernel


def craft_loss(pred: jnp.ndarray, gt: jnp.ndarray, *, tb: int | None = None) -> jnp.ndarray:
    """JAX/Pallas equivalent of CRAFTLoss.forward(pred, gt)."""
    assert pred.ndim == 4 and gt.ndim == 4, "expected 4-D pred and gt"

    if pred.shape[3] == 2:
        # NHWC (B,H,W,2): the PyTorch module permutes pred to NCHW.  We instead keep
        # channels-last and fold C into the lane axis (free reshape of pred); only the
        # smaller gt is transposed, and the column-interp matrix becomes kron(wwt, I_C).
        # NOTE: the gt transpose is a full HBM read+write of gt -- cheap in the common
        # CRAFT case where gt is the half-resolution score map.
        # TODO(synk): fuse the channel interleave into the kernel for same-size gt.
        B, Hp, Wp, C = pred.shape
        Bg, Cg, Hg, Wg = gt.shape
        assert B == Bg and C == Cg, "pred/gt batch or channel mismatch"
        pred_k = pred.reshape(B, Hp, Wp * C)                               # free view
        gt_k = jnp.transpose(gt, (0, 2, 3, 1)).reshape(B, Hg, Wg * C)
        n = B
        wlp, wlg = Wp * C, Wg * C
        c_interleave = C
    else:
        B, C, Hp, Wp = pred.shape
        Bg, Cg, Hg, Wg = gt.shape
        assert B == Bg and C == Cg, "pred/gt batch or channel mismatch"
        pred_k = pred.reshape(B * C, Hp, Wp)                               # free view
        gt_k = gt.reshape(B * C, Hg, Wg)                                   # free view
        n = B * C
        wlp, wlg = Wp, Wg
        c_interleave = 1

    needs_resize = (Hp != Hg) or (Wp != Wg)
    hw = _hw_config()

    # Matmul-operand dtype: keep bf16/f16 gt native for the MXU (acc stays f32).
    gdt = gt_k.dtype
    use_lowp = needs_resize and (gdt == jnp.bfloat16 or gdt == jnp.float16)
    mm_dtype = gdt if use_lowp else jnp.float32
    mm_bytes = 2 if use_lowp else 4
    mm_is_f32 = not use_lowp

    inputs = [pred_k, gt_k]
    if needs_resize:
        wh = _interp_matrix(Hp, Hg)                   # (Hp, Hg)
        wwt = _interp_matrix(Wp, Wg).T                # (Wg, Wp)
        if c_interleave > 1:
            wwt = jnp.kron(wwt, jnp.eye(c_interleave, dtype=jnp.float32))  # (Wg*C, Wp*C)
        inputs += [wh.astype(mm_dtype), wwt.astype(mm_dtype)]

    if tb is None:
        tb = _choose_tb(n, Hp, wlp, Hg, wlg,
                        pred_k.dtype.itemsize, gt_k.dtype.itemsize, mm_bytes,
                        needs_resize, hw["vmem_budget"])
    tb = max(1, min(int(tb), n))

    # Padding-aware static matmul-order choice (MXU tile 128 on v5e, 256 otherwise).
    # NOTE: the merged reshape (tb,H,W)->(tb*H,W) is only a free view when H % 8 == 0;
    # otherwise Mosaic inserts a (correct) relayout copy.
    cols_first = True
    if needs_resize:
        mxu = hw["mxu_dim"]

        def _pad(x, m):
            return -(-x // m) * m

        cost_cols_first = (_pad(tb * Hg, 8) * _pad(wlg, mxu) * _pad(wlp, mxu)
                           + tb * _pad(Hp, 8) * _pad(Hg, mxu) * _pad(wlp, mxu))
        cost_rows_first = (tb * _pad(Hp, 8) * _pad(Hg, mxu) * _pad(wlg, mxu)
                           + _pad(tb * Hp, 8) * _pad(wlg, mxu) * _pad(wlp, mxu))
        cols_first = cost_cols_first <= cost_rows_first

    num_blocks = _cdiv(n, tb)
    p_parts = 2 if (hw["multi_tc"] and num_blocks >= 2) else 1
    g_steps = _cdiv(num_blocks, p_parts)
    need_mask = (p_parts * g_steps * tb) != n

    def data_idx(p, g):
        # Clamp so overflow slots re-read the last (fully masked) block in-bounds.
        return (jnp.minimum(p * g_steps + g, num_blocks - 1), 0, 0)

    in_specs = [
        pl.BlockSpec((tb, Hp, wlp), data_idx),        # pred channel-batch
        pl.BlockSpec((tb, Hg, wlg), data_idx),        # gt channel-batch
    ]
    if needs_resize:
        in_specs += [
            pl.BlockSpec((Hp, Hg), lambda p, g: (0, 0)),      # row interp matrix
            pl.BlockSpec((wlg, wlp), lambda p, g: (0, 0)),    # col interp matrix^T
        ]

    kernel = _make_kernel(needs_resize=needs_resize, cols_first=cols_first,
                          need_mask=need_mask, n_valid=n, mm_is_f32=mm_is_f32)

    partials = pl.pallas_call(
        kernel,
        out_shape=jax.ShapeDtypeStruct((p_parts, 1, wlp), jnp.float32),
        grid_spec=pltpu.PrefetchScalarGridSpec(
            num_scalar_prefetch=0,
            grid=(p_parts, g_steps),
            in_specs=in_specs,
            out_specs=pl.BlockSpec((1, 1, wlp), lambda p, g: (p, 0, 0)),
            scratch_shapes=[pltpu.VMEM((1, Hp, wlp), jnp.float32)],
        ),
        compiler_params=pltpu.CompilerParams(
            dimension_semantics=("parallel", "arbitrary"),
            vmem_limit_bytes=hw["vmem_limit"]),
    )(*inputs)

    total_elems = float(n) * float(Hp) * float(wlp)
    return jnp.sum(partials) / total_elems


def _reference_loss(pred, gt):
    """Pure-JAX reference (PyTorch bilinear align_corners=False semantics)."""
    if pred.ndim == 4 and pred.shape[3] == 2:
        pred = jnp.transpose(pred, (0, 3, 1, 2))
    _, _, Hp, Wp = pred.shape
    _, _, Hg, Wg = gt.shape
    pred = pred.astype(jnp.float32)
    gt = gt.astype(jnp.float32)
    if (Hp, Wp) != (Hg, Wg):
        wh = _interp_matrix(Hp, Hg)
        ww = _interp_matrix(Wp, Wg)
        gt = jnp.einsum('hg,bcgw,vw->bchv', wh, gt, ww)
    return jnp.mean((pred - gt) ** 2)


if __name__ == "__main__":
    key = jax.random.PRNGKey(0)
    k1, k2, k3, k4, k5, k6 = jax.random.split(key, 6)

    # 1) NHWC pred with 2 channels (permute branch) + bilinear upscale of gt.
    pred1 = jax.random.normal(k1, (2, 16, 16, 2), dtype=jnp.float32)
    gt1 = jax.random.normal(k2, (2, 2, 8, 8), dtype=jnp.float32)
    out1 = craft_loss(pred1, gt1)
    jax.block_until_ready(out1)
    ref1 = _reference_loss(pred1, gt1)
    assert jnp.allclose(out1, ref1, rtol=1e-5, atol=1e-6), (out1, ref1)

    # 2) NCHW pred/gt, same spatial size (no resize), bf16 inputs (no wrapper cast).
    pred2 = jax.random.normal(k3, (2, 4, 16, 16)).astype(jnp.bfloat16)
    gt2 = jax.random.normal(k4, (2, 4, 16, 16)).astype(jnp.bfloat16)
    out2 = craft_loss(pred2, gt2)
    jax.block_until_ready(out2)
    ref2 = _reference_loss(pred2, gt2)
    assert jnp.allclose(out2, ref2, rtol=1e-4, atol=1e-5), (out2, ref2)

    # 3) NCHW + resize with a forced small channel-batch (tb=3 over 8 slices) so the
    #    partial-block mask (pl.when-gated) and the block-index clamp both run.
    pred3 = jax.random.normal(k5, (2, 4, 16, 16), dtype=jnp.float32)
    gt3 = jax.random.normal(k6, (2, 4, 8, 8), dtype=jnp.float32)
    out3 = craft_loss(pred3, gt3, tb=3)
    jax.block_until_ready(out3)
    ref3 = _reference_loss(pred3, gt3)
    assert jnp.allclose(out3, ref3, rtol=1e-5, atol=1e-6), (out3, ref3)

    print("KERNEL_OK")
</pallas_src>

<mosaic_0001>
module attributes {stable_mosaic.version = 11 : i64} {
  func.func @kernel(%arg0: i32, %arg1: i32, %arg2: memref<2x16x32xf32, #tpu.memory_space<vmem>>, %arg3: memref<2x8x16xf32, #tpu.memory_space<vmem>>, %arg4: memref<16x8xf32, #tpu.memory_space<vmem>>, %arg5: memref<16x32xf32, #tpu.memory_space<vmem>>, %arg6: memref<1x1x32xf32, #tpu.memory_space<vmem>>, %arg7: memref<1x16x32xf32, #tpu.memory_space<vmem>>) attributes {dimension_semantics = [#tpu.dimension_semantics<parallel>, #tpu.dimension_semantics<arbitrary>], iteration_bounds = array<i64: 1, 1>, scalar_prefetch = 0 : i64, scratch_operands = 1 : i64, tpu.core_type = #tpu.core_type<tc>, window_params = [{transform_indices = @transform_0, window_bounds = array<i64: 2, 16, 32>}, {transform_indices = @transform_1, window_bounds = array<i64: 2, 8, 16>}, {pipeline_mode = #tpu.pipeline_mode<synchronous>, transform_indices = @transform_2, window_bounds = array<i64: 16, 8>}, {pipeline_mode = #tpu.pipeline_mode<synchronous>, transform_indices = @transform_3, window_bounds = array<i64: 16, 32>}, {transform_indices = @transform_4, window_bounds = array<i64: 1, 1, 32>}]} {
    %c0_i32 = arith.constant 0 : i32
    %0 = arith.cmpi eq, %arg1, %c0_i32 : i32
    %1 = arith.extui %0 : i1 to i32
    %c0_i32_0 = arith.constant 0 : i32
    %2 = arith.cmpi ne, %1, %c0_i32_0 : i32
    scf.if %2 {
      %cst_20 = arith.constant 0.000000e+00 : f32
      %23 = vector.broadcast %cst_20 : f32 to vector<1x16x32xf32>
      %c0_21 = arith.constant 0 : index
      %c0_22 = arith.constant 0 : index
      %c0_23 = arith.constant 0 : index
      %24 = vector.load %arg7[%c0_21, %c0_22, %c0_23] : memref<1x16x32xf32, #tpu.memory_space<vmem>>, vector<1x16x32xf32>
      tpu.vector_store %arg7[%c0_21, %c0_22, %c0_23], %23 {strides = array<i32>} : memref<1x16x32xf32, #tpu.memory_space<vmem>>, vector<1x16x32xf32>,
    } else {
    }
    %c0 = arith.constant 0 : index
    %c0_1 = arith.constant 0 : index
    %c0_2 = arith.constant 0 : index
    %3 = vector.load %arg2[%c0, %c0_1, %c0_2] : memref<2x16x32xf32, #tpu.memory_space<vmem>>, vector<2x16x32xf32>
    %c0_3 = arith.constant 0 : index
    %c0_4 = arith.constant 0 : index
    %4 = vector.load %arg4[%c0_3, %c0_4] : memref<16x8xf32, #tpu.memory_space<vmem>>, vector<16x8xf32>
    %c0_5 = arith.constant 0 : index
    %c0_6 = arith.constant 0 : index
    %5 = vector.load %arg5[%c0_5, %c0_6] : memref<16x32xf32, #tpu.memory_space<vmem>>, vector<16x32xf32>
    %c0_7 = arith.constant 0 : index
    %c0_8 = arith.constant 0 : index
    %c0_9 = arith.constant 0 : index
    %6 = vector.load %arg3[%c0_7, %c0_8, %c0_9] : memref<2x8x16xf32, #tpu.memory_space<vmem>>, vector<2x8x16xf32>
    %7 = vector.shape_cast %6 : vector<2x8x16xf32> to vector<16x16xf32>
    %cst = arith.constant dense<0.000000e+00> : vector<16x32xf32>
    %8 = tpu.matmul %7, %5, %cst {dimension_numbers = #tpu.dot_dimension_numbers<[1], [0], [0], [1], [0, 0, 1, 1], [], []>} : vector<16x16xf32>, vector<16x32xf32>, vector<16x32xf32> -> vector<16x32xf32>
    %9 = vector.shape_cast %8 : vector<16x32xf32> to vector<2x8x32xf32>
    %10 = vector.shape_cast %4 : vector<16x8xf32> to vector<1x16x8xf32>
    %11 = vector.broadcast %10 : vector<1x16x8xf32> to vector<2x16x8xf32>
    "tpu.trace_start"() <{level = 10 : i32, message = "bhg,bgw->bhw"}> : () -> ()
    %cst_10 = arith.constant dense<0.000000e+00> : vector<2x16x32xf32>
    %12 = tpu.matmul %11, %9, %cst_10 {dimension_numbers = #tpu.dot_dimension_numbers<[2], [1], [1], [2], [0, 0, 0, 1, 1, 2], [0], [0]>} : vector<2x16x8xf32>, vector<2x8x32xf32>, vector<2x16x32xf32> -> vector<2x16x32xf32>
    "tpu.trace_stop"() : () -> ()
    %13 = arith.subf %3, %12 : vector<2x16x32xf32>
    %14 = arith.mulf %13, %13 : vector<2x16x32xf32>
    %c0_11 = arith.constant 0 : index
    %c0_12 = arith.constant 0 : index
    %c0_13 = arith.constant 0 : index
    %15 = vector.load %arg7[%c0_11, %c0_12, %c0_13] : memref<1x16x32xf32, #tpu.memory_space<vmem>>, vector<1x16x32xf32>
    %cst_14 = arith.constant dense<0.000000e+00> : vector<16x32xf32>
    %16 = vector.multi_reduction <add>, %14, %cst_14 [0] : vector<2x16x32xf32> to vector<16x32xf32>
    %17 = vector.shape_cast %16 : vector<16x32xf32> to vector<1x16x32xf32>
    %18 = arith.addf %15, %17 : vector<1x16x32xf32>
    %c0_15 = arith.constant 0 : index
    %c0_16 = arith.constant 0 : index
    %c0_17 = arith.constant 0 : index
    %19 = vector.load %arg7[%c0_15, %c0_16, %c0_17] : memref<1x16x32xf32, #tpu.memory_space<vmem>>, vector<1x16x32xf32>
    tpu.vector_store %arg7[%c0_15, %c0_16, %c0_17], %18 {strides = array<i32>} : memref<1x16x32xf32, #tpu.memory_space<vmem>>, vector<1x16x32xf32>,
    %c0_i32_18 = arith.constant 0 : i32
    %20 = arith.cmpi eq, %arg1, %c0_i32_18 : i32
    %21 = arith.extui %20 : i1 to i32
    %c0_i32_19 = arith.constant 0 : i32
    %22 = arith.cmpi ne, %21, %c0_i32_19 : i32
    scf.if %22 {
      %c0_20 = arith.constant 0 : index
      %c0_21 = arith.constant 0 : index
      %c0_22 = arith.constant 0 : index
      %23 = vector.load %arg7[%c0_20, %c0_21, %c0_22] : memref<1x16x32xf32, #tpu.memory_space<vmem>>, vector<1x16x32xf32>
      %cst_23 = arith.constant dense<0.000000e+00> : vector<1x32xf32>
      %24 = vector.multi_reduction <add>, %23, %cst_23 [1] : vector<1x16x32xf32> to vector<1x32xf32>
      %25 = vector.shape_cast %24 : vector<1x32xf32> to vector<1x1x32xf32>
      %c0_24 = arith.constant 0 : index
      %c0_25 = arith.constant 0 : index
      %c0_26 = arith.constant 0 : index
      %26 = vector.load %arg6[%c0_24, %c0_25, %c0_26] : memref<1x1x32xf32, #tpu.memory_space<vmem>>, vector<1x1x32xf32>
      tpu.vector_store %arg6[%c0_24, %c0_25, %c0_26], %25 {strides = array<i32>} : memref<1x1x32xf32, #tpu.memory_space<vmem>>, vector<1x1x32xf32>,
    } else {
    }
    return
  }
  func.func @transform_0(%arg0: i32, %arg1: i32) -> (i32, i32, i32) {
    %c1_i32 = arith.constant 1 : i32
    %0 = arith.muli %arg0, %c1_i32 : i32
    %1 = arith.addi %0, %arg1 : i32
    %c0_i32 = arith.constant 0 : i32
    %2 = arith.minsi %1, %c0_i32 : i32
    %c0_i32_0 = arith.constant 0 : i32
    %c0_i32_1 = arith.constant 0 : i32
    %c0_i32_2 = arith.constant 0 : i32
    return %2, %c0_i32_0, %c0_i32_1 : i32, i32, i32
  }
  func.func @transform_1(%arg0: i32, %arg1: i32) -> (i32, i32, i32) {
    %c1_i32 = arith.constant 1 : i32
    %0 = arith.muli %arg0, %c1_i32 : i32
    %1 = arith.addi %0, %arg1 : i32
    %c0_i32 = arith.constant 0 : i32
    %2 = arith.minsi %1, %c0_i32 : i32
    %c0_i32_0 = arith.constant 0 : i32
    %c0_i32_1 = arith.constant 0 : i32
    %c0_i32_2 = arith.constant 0 : i32
    return %2, %c0_i32_0, %c0_i32_1 : i32, i32, i32
  }
  func.func @transform_2(%arg0: i32, %arg1: i32) -> (i32, i32) {
    %c0_i32 = arith.constant 0 : i32
    %c0_i32_0 = arith.constant 0 : i32
    %c0_i32_1 = arith.constant 0 : i32
    return %c0_i32, %c0_i32_0 : i32, i32
  }
  func.func @transform_3(%arg0: i32, %arg1: i32) -> (i32, i32) {
    %c0_i32 = arith.constant 0 : i32
    %c0_i32_0 = arith.constant 0 : i32
    %c0_i32_1 = arith.constant 0 : i32
    return %c0_i32, %c0_i32_0 : i32, i32
  }
  func.func @transform_4(%arg0: i32, %arg1: i32) -> (i32, i32, i32) {
    %c0_i32 = arith.constant 0 : i32
    %c0_i32_0 = arith.constant 0 : i32
    %c0_i32_1 = arith.constant 0 : i32
    return %arg0, %c0_i32, %c0_i32_0 : i32, i32, i32
  }
}

</mosaic_0001>

<bundles_post_ra>
// kernel: tpu_custom_call.1
= control target key start
LH: loop header
LB: loop body
LE: loop exit
PB: predicated region body
PF: predicated region fallthrough
CT: control target
= control target key end

     0   :  { %9 = vsyncpa [#allocation4], 0  ;;  %s563_s0 = inlined_call_operand.hbm [shape: f32[2,16,32], index: 0, kind: input, shape index: {}]   ;;  %s564_s1 = inlined_call_operand.vmem [shape: f32[2,8,16], index: 1, kind: input, shape index: {}]   ;;  %s565_s2 = inlined_call_operand.vmem [shape: f32[16,8], index: 2, kind: input, shape index: {}]   ;;  %s566_s3 = inlined_call_operand.vmem [shape: f32[16,32], index: 3, kind: input, shape index: {}]   ;;  %s567_s4 = inlined_call_operand.hbm [shape: f32[1,1,32], index: 4, kind: output, shape index: {}]  }
   0x1   :  { %10 = vsyncpa [#allocation5], 0  ;;  %s481_s15 = smov [#allocation3]   ;;  %s433_s19 = scalar_lea.hbm %s563_s0, 512 }
   0x2   :  { %s23_s16 = sshll.u32 %s481_s15, 4  ;;  %p434_p0 = scmp.ne.s32.totalorder %s563_s0, %s433_s19  ;;  %s24_s16 = int_to_ptr.vmem [resolvable:$true] %s23_s16 }
   0x3   :  { %p437_p1 = scmp.lt.u32.totalorder %s433_s19, %s563_s0 }
   0x5   :  { %p439_p2 = pnand %p437_p1, %p434_p0 }
   0x7   :  { %442 = shalt.err (!%p439_p2)
}
   0x8   :  { %s443_s24 = scalar_lea.vmem %s24_s16, 512  ;;  %p448_p4 = scmp.lt.s32.totalorder %s24_s16, %s24_s16 }
   0x9   :  { %p444_p3 = scmp.ne.s32.totalorder %s24_s16, %s443_s24  ;;  %p449_p5 = scmp.lt.s32.totalorder %s443_s24, %s443_s24 }
   0xb   :  { %p450_p6 = por %p449_p5, %p448_p4 }
   0xd   :  { %p451_p7 = pnand %p450_p6, %p444_p3 }
   0xf   :  { %454 = shalt.err (!%p451_p7)
}
  0x10   :  { %s482_s25 = smov 128   ;;  %s483_s26 = smov 8  }
  0x11   :  { %29 = dma.hbm_to_vmem [thread:$0]  %s563_s0, 512, %s24_s16, [#allocation4], %s482_s25, %s482_s25, %s483_s26  }
  0x12   :  { %477 = dma.done.wait [#allocation4], 512  }
  0x13   :  { %478 = vsyncadd [#allocation4], 4294966784  ;;  %vm92_vm0 = vcmask 130048   ;;  %v88_v0 = vld [vmem:[%s566_s3] sm:$0xff]  ;;  %v89_v1 = vld [vmem:[%s566_s3 + $0x8] sm:$0xff]  ;;  %vm174_vm1 = vcmask 64512  }
  0x14   :  { %v90_v2 = vld [vmem:[%s564_s1] sm:$0xff]  ;;  %v424_v3 = vpack.c.bf16 %v89_v1, %v88_v0  ;;  %v91_v4 = vld [vmem:[%s564_s1 + $0x8] sm:$0xff]  ;;  %vm79_vm2 = vcmask 261120   ;;  %v484_v9 = vmov 0.0   ;;  %v83_v10 = vld [vmem:[#allocation3 + $0x8] sm:$0xff]  ;;  %s485_s1 = smov [#allocation6]  }
  0x15   :  { %411 = vmatprep.mubr.msk.f32.mxu0 %vm92_vm0, %v90_v2  ;;  %v86_v5 = vld [vmem:[%s565_s2] sm:$0xff]  ;;  %v87_v8 = vld [vmem:[%s565_s2 + $0x8] sm:$0xff]  ;;  %81 = vst.msk [vmem:[#allocation2 + $0x8] sm:$0xff] %vm79_vm2, %v484_v9  ;;  %80 = vst.msk [vmem:[#allocation2] sm:$0xff] %vm79_vm2, %v484_v9  ;;  %s374_s2 = sshll.u32 %s485_s1, 4  ;;  %vm366_vm3 = vcmask 253952   ;;  %s375_s2 = int_to_ptr.vmem [resolvable:$true] %s374_s2 }
  0x16   :  { %425 = vmatprep.subr.bf16.mxu0 %v424_v3  ;;  %416 = vmatprep.mubr.msk.f32.mxu1 %vm174_vm1, %v86_v5  ;;  %v82_v11 = vld [vmem:[#allocation3] sm:$0xff]  ;;  %v85_v16 = vld [vmem:[#allocation3 + $0x18] sm:$0xff]  ;;  %v84_v17 = vld [vmem:[#allocation3 + $0x10] sm:$0xff]  ;;  %s455_s13 = scalar_lea.vmem %s375_s2, 16  ;;  %s459_s14 = scalar_lea.vmem %s375_s2, 32 }
  0x17   :  { %427 = vmatpush3.bf16.msra.mxu0 %v424_v3  ;;  %p456_p8 = scmp.ne.s32.totalorder %s375_s2, %s455_s13  ;;  %p460_p9 = scmp.lt.s32.totalorder %s375_s2, %s375_s2 }
  0x18   :  { %p461_p10 = scmp.lt.s32.totalorder %s459_s14, %s455_s13 }
  0x1a   :  { %412 = vmatmul.mubr.msk.f32.vlgmr.msra.gmra.mrb[0].mxu0 %vm92_vm0, %v91_v4  ;;  %p462_p11 = por %p461_p10, %p460_p9 }
  0x1c   :  { %v340_v27 = vld [vmem:[#allocation2 + $0x8] sm:$0xff]  ;;  %v339_v31 = vld [vmem:[#allocation2] sm:$0xff]  ;;  %p463_p12 = pnand %p462_p11, %p456_p8 }
  0xed   :  { %v413_v6 = vpop.f32.mrb[0].mxu0 }
  0xee   :  { %v165_v7 = vpop.f32.mrb[1].mxu0 }
  0xef   :  { %414 = vmatprep.subr.mxu1 %v165_v7 }
  0xf0   :  { %415 = vmatpush3.msra.mxu1 %v165_v7 }
  0xf1   :  { %417 = vmatmul.mubr.msk.f32.vlgmr.msra.gmra.mrb[0].mxu1 %vm174_vm1, %v87_v8  ;;  %419 = vmatprep.subr.mxu1 %v413_v6 }
  0xf2   :  { %420 = vmatpush3.msra.mxu1 %v413_v6  ;;  %421 = vmatprep.mubr.msk.f32.mxu1 %vm174_vm1, %v86_v5 }
  0xf5   :  { %422 = vmatmul.mubr.msk.f32.vlgmr.msra.gmra.mrb[2].mxu1 %vm174_vm1, %v87_v8 }
 0x1c4   :  { %v418_v12 = vpop.f32.mrb[0].mxu1 }
 0x1c5   :  { %v332_v13 = vsub.f32 %v83_v10, %v418_v12  ;;  %v247_v14 = vpop.f32.mrb[1].mxu1 }
 0x1c6   :  { %v331_v15 = vsub.f32 %v82_v11, %v247_v14 }
 0x1c7   :  { %v336_v19 = vmul.f32 %v332_v13, %v332_v13 }
 0x1c8   :  { %v423_v18 = vpop.f32.mrb[2].mxu1  ;;  %v335_v22 = vmul.f32 %v331_v15, %v331_v15 }
 0x1c9   :  { %v334_v20 = vsub.f32 %v85_v16, %v423_v18  ;;  %v322_v21 = vpop.f32.mrb[3].mxu1  ;;  %v345_v26 = vsel %vm79_vm2, %v336_v19, 0.0 }
 0x1ca   :  { %v333_v23 = vsub.f32 %v84_v17, %v322_v21  ;;  %v342_v29 = vsel %vm79_vm2, %v335_v22, 0.0 }
 0x1cb   :  { %v338_v24 = vmul.f32 %v334_v20, %v334_v20 }
 0x1cc   :  { %v337_v25 = vmul.f32 %v333_v23, %v333_v23 }
 0x1cd   :  { %v346_v28 = vsel %vm79_vm2, %v338_v24, 0.0 }
 0x1ce   :  { %v347_v30 = vadd.f32 %v346_v28, %v345_v26  ;;  %v343_v32 = vsel %vm79_vm2, %v337_v25, 0.0 }
 0x1cf   :  { %v344_v33 = vadd.f32 %v343_v32, %v342_v29 }
 0x1d0   :  { %v349_v34 = vadd.f32 %v347_v30, %v340_v27 }
 0x1d1   :  { %v348_v35 = vadd.f32 %v344_v33, %v339_v31 }
 0x1d2   :  { %351 = vst.msk [vmem:[#allocation2 + $0x8] sm:$0xff] %vm79_vm2, %v349_v34 }
 0x1d3   :  { %350 = vst.msk [vmem:[#allocation2] sm:$0xff] %vm79_vm2, %v348_v35 }
 0x1d9   :  { %v356_v36 = vld [vmem:[#allocation2 + $0x8] sm:$0xff] }
 0x1da   :  { %v355_v37 = vld [vmem:[#allocation2] sm:$0xff]  ;;  %v358_v38 = vsel %vm79_vm2, %v356_v36, 0.0 }
 0x1db   :  { %v357_v39 = vsel %vm79_vm2, %v355_v37, 0.0 }
 0x1dc   :  { %v359_v40 = vadd.f32 %v358_v38, %v357_v39 }
 0x1de   :  { %v360_v41 = vrot.slane %v359_v40, 4 }
 0x1e0   :  { %v361_v42 = vadd.f32 %v360_v41, %v359_v40 }
 0x1e2   :  { %v362_v43 = vrot.slane %v361_v42, 2 }
 0x1e4   :  { %v363_v44 = vadd.f32 %v362_v43, %v361_v42 }
 0x1e6   :  { %v364_v45 = vrot.slane %v363_v44, 1 }
 0x1e8   :  { %v365_v46 = vadd.f32 %v364_v45, %v363_v44 }
 0x1ea   :  { %367 = vst.msk [vmem:[#allocation6] sm:$0x1] %vm366_vm3, %v365_v46 }
 0x1eb   :  { %466 = shalt.err (!%p463_p12)
}
 0x1ec   :  { %s467_s17 = scalar_lea.hbm %s567_s4, 16 }
 0x1ed   :  { %p468_p13 = scmp.ne.s32.totalorder %s567_s4, %s467_s17  ;;  %p471_p0 = scmp.lt.u32.totalorder %s467_s17, %s567_s4 }
 0x1ef   :  { %p473_p1 = pnand %p471_p0, %p468_p13 }
 0x1f1   :  { %476 = shalt.err (!%p473_p1)
}
 0x1f2   :  { %377 = dma.vmem_to_hbm [thread:$0]  %s375_s2, 16, %s567_s4, [#allocation5]  }
 0x1f3   :  { %479 = dma.done.wait [#allocation5], 16  }
 0x1f4   :  { %480 = vsyncadd [#allocation5], 4294967280 }
 0x1f5   :  { %381 = vsyncpa [#allocation4], 1 }
 0x1f6   :  { %382 = vsyncpa [#allocation5], 1 }

</bundles_post_ra>
